<compile_context>
chip_gen: v7x
topology: tpu7x:2x2x1
jax: 0.10.0
libtpu: 0.0.40
codegen_flags: <defaults>
</compile_context>

<pallas_src>
import functools

import jax
import jax.numpy as jnp
from jax.experimental import pallas as pl
from jax.experimental.pallas import tpu as pltpu


# ---------------- fused sincos (shared range reduction) ----------------------
_TWO_OVER_PI = 0.6366197723675814
# pi/2 split into exactly-representable f32 pieces.
_PIO2_HI = 1.5703125
_PIO2_MID = 4.837512969970703125e-4
# NOTE: the third (_PIO2_LO) reduction term is intentionally dropped: for
# activation-range |x| the extra error is ~n * 7.5e-8, far below the f32
# output tolerance.  This is NOT a Payne-Hanek reduction; quadrant selection
# degrades for astronomically large |x| (same caveat as most fast sincos).


def _sincos_f32(x):
    """sin(x), cos(x) for f32 x with one shared range reduction."""
    n = jnp.floor(x * _TWO_OVER_PI + 0.5)            # nearest multiple of pi/2
    q = n.astype(jnp.int32)                          # quadrant (bitwise ops below
                                                     # handle negatives correctly)
    r = (x - n * _PIO2_HI) - n * _PIO2_MID
    r2 = r * r
    # minimax polynomials on [-pi/4, pi/4] (Cephes single-precision coeffs)
    sp = -1.9515295891e-4
    sp = sp * r2 + 8.3321608736e-3
    sp = sp * r2 - 1.6666654611e-1
    sin_r = r + r * r2 * sp
    cp = 2.443315711809948e-5
    cp = cp * r2 - 1.388731625493765e-3
    cp = cp * r2 + 4.166664568298827e-2
    cos_r = 1.0 - 0.5 * r2 + r2 * r2 * cp
    # quadrant swap
    swap = (q & 1) == 1
    s = jnp.where(swap, cos_r, sin_r)
    c = jnp.where(swap, sin_r, cos_r)
    # quadrant sign flip via sign-bit XOR (cheaper than select(-x, x) on the VALU)
    qu = q.astype(jnp.uint32)
    s_sign = (qu & 2) << 30                          # 0 or 0x80000000
    c_sign = ((qu + 1) & 2) << 30
    s = pltpu.bitcast(pltpu.bitcast(s, jnp.uint32) ^ s_sign, jnp.float32)
    c = pltpu.bitcast(pltpu.bitcast(c, jnp.uint32) ^ c_sign, jnp.float32)
    return s, c


# ---------------- kernel ------------------------------------------------------
def _trigno_kernel(x_ref, o_ref, *, d):
    x = x_ref[...]                                   # (tR, D)
    s, c = _sincos_f32(x.astype(jnp.float32))
    # Three direct slice stores instead of concatenate + one big store:
    # avoids a (tR, 3D) VMEM temporary and the extra ld/st traffic.
    o_ref[:, 0:d] = x
    o_ref[:, d:2 * d] = s.astype(o_ref.dtype)
    o_ref[:, 2 * d:3 * d] = c.astype(o_ref.dtype)


# ---------------- wrapper -----------------------------------------------------
def _sublane_multiple(dtype):
    itemsize = jnp.dtype(dtype).itemsize
    return 8 * max(1, 4 // itemsize)                 # 8 f32, 16 bf16, 32 int8


def trigno(x, *, target_in_tile_bytes=2 << 20, min_row_blocks=4,
           vmem_limit_bytes=48 << 20):
    """x: (..., D) -> (..., 3*D), same dtype (== torch.cat([x, sin, cos], -1))."""
    *lead, D = x.shape
    n_rows = 1
    for dim in lead:
        n_rows *= dim
    x2 = x.reshape(n_rows, D)                        # free (row-major contiguous)

    itemsize = jnp.dtype(x.dtype).itemsize
    sub = _sublane_multiple(x.dtype)

    # Row tile from the VMEM budget (~2 MiB in-tile => ~16 MiB live: in + 3x
    # out, double-buffered), capped so there are >= min_row_blocks grid steps
    # when the row count allows it (pipelining + v7x 2-TC split).
    tR = max(sub, (target_in_tile_bytes // (itemsize * D) // sub) * sub)
    cap = max(sub, ((pl.cdiv(n_rows, min_row_blocks) + sub - 1) // sub) * sub)
    tR = min(tR, cap)
    if tR >= n_rows:
        tR = n_rows                                  # single full block: always legal

    grid = (pl.cdiv(n_rows, tR),)

    n_elem = n_rows * D
    cost = pl.CostEstimate(
        flops=38 * n_elem,                           # shared reduction + 2 polys
        transcendentals=0,
        bytes_accessed=4 * n_elem * itemsize,        # read x, write [x | sin | cos]
    )

    out2 = pl.pallas_call(
        functools.partial(_trigno_kernel, d=D),
        out_shape=jax.ShapeDtypeStruct((n_rows, 3 * D), x.dtype),
        grid_spec=pl.GridSpec(
            grid=grid,
            in_specs=[pl.BlockSpec((tR, D), lambda r: (r, 0))],
            # NOTE: lane density follows D; for production models prefer D a
            # multiple of 128 so every slice store is an unmasked full-lane vst.
            out_specs=pl.BlockSpec((tR, 3 * D), lambda r: (r, 0)),
        ),
        compiler_params=pltpu.CompilerParams(
            dimension_semantics=("parallel",),       # shards row tiles across TCs
            vmem_limit_bytes=vmem_limit_bytes,       # <= v7x 64 MiB physical
        ),
        cost_estimate=cost,
    )(x2)
    return out2.reshape(*lead, 3 * D)


# ---------------- test --------------------------------------------------------
if __name__ == "__main__":
    key = jax.random.PRNGKey(0)

    # small shapes consistent with the module: batch=2, seq=8, hidden=32
    x = jax.random.normal(key, (2, 8, 32), dtype=jnp.float32)
    out = jax.block_until_ready(trigno(x))
    ref = jnp.concatenate([x, jnp.sin(x), jnp.cos(x)], axis=-1)
    assert out.shape == (2, 8, 96), out.shape
    assert out.dtype == x.dtype
    assert jnp.allclose(out, ref, atol=1e-5, rtol=1e-5)

    # exercise the multi-tile (row-tiled) path with a tiny tile budget
    x2 = 4.0 * jax.random.normal(jax.random.PRNGKey(0), (2, 64, 32),
                                 dtype=jnp.float32)
    out2 = jax.block_until_ready(trigno(x2, target_in_tile_bytes=4096))
    ref2 = jnp.concatenate([x2, jnp.sin(x2), jnp.cos(x2)], axis=-1)
    assert out2.shape == (2, 64, 96), out2.shape
    assert jnp.allclose(out2, ref2, atol=1e-5, rtol=1e-5)

    print("KERNEL_OK")
</pallas_src>

<mosaic_0001>
module attributes {stable_mosaic.version = 11 : i64} {
  func.func @_trigno_kernel(%arg0: i32, %arg1: memref<8x32xf32, #tpu.memory_space<vmem>>, %arg2: memref<8x96xf32, #tpu.memory_space<vmem>>) attributes {dimension_semantics = [#tpu.dimension_semantics<parallel>], iteration_bounds = array<i64: 2>, scalar_prefetch = 0 : i64, scratch_operands = 0 : i64, tpu.core_type = #tpu.core_type<tc>, window_params = [{transform_indices = @transform_0, window_bounds = array<i64: 8, 32>}, {transform_indices = @transform_1, window_bounds = array<i64: 8, 96>}]} {
    %c0 = arith.constant 0 : index
    %c0_0 = arith.constant 0 : index
    %0 = vector.load %arg1[%c0, %c0_0] : memref<8x32xf32, #tpu.memory_space<vmem>>, vector<8x32xf32>
    %cst = arith.constant 0.636619746 : f32
    %1 = vector.broadcast %cst : f32 to vector<8x32xf32>
    %2 = arith.mulf %0, %1 : vector<8x32xf32>
    %cst_1 = arith.constant 5.000000e-01 : f32
    %3 = vector.broadcast %cst_1 : f32 to vector<8x32xf32>
    %4 = arith.addf %2, %3 : vector<8x32xf32>
    %5 = math.floor %4 : vector<8x32xf32>
    %6 = arith.fptosi %5 : vector<8x32xf32> to vector<8x32xi32>
    %cst_2 = arith.constant 1.5703125 : f32
    %7 = vector.broadcast %cst_2 : f32 to vector<8x32xf32>
    %8 = arith.mulf %5, %7 : vector<8x32xf32>
    %9 = arith.subf %0, %8 : vector<8x32xf32>
    %cst_3 = arith.constant 4.83751297E-4 : f32
    %10 = vector.broadcast %cst_3 : f32 to vector<8x32xf32>
    %11 = arith.mulf %5, %10 : vector<8x32xf32>
    %12 = arith.subf %9, %11 : vector<8x32xf32>
    %13 = arith.mulf %12, %12 : vector<8x32xf32>
    %cst_4 = arith.constant -1.95152956E-4 : f32
    %14 = vector.broadcast %cst_4 : f32 to vector<8x32xf32>
    %15 = arith.mulf %14, %13 : vector<8x32xf32>
    %cst_5 = arith.constant 0.00833216123 : f32
    %16 = vector.broadcast %cst_5 : f32 to vector<8x32xf32>
    %17 = arith.addf %15, %16 : vector<8x32xf32>
    %18 = arith.mulf %17, %13 : vector<8x32xf32>
    %cst_6 = arith.constant 0.166666552 : f32
    %19 = vector.broadcast %cst_6 : f32 to vector<8x32xf32>
    %20 = arith.subf %18, %19 : vector<8x32xf32>
    %21 = arith.mulf %12, %13 : vector<8x32xf32>
    %22 = arith.mulf %21, %20 : vector<8x32xf32>
    %23 = arith.addf %12, %22 : vector<8x32xf32>
    %cst_7 = arith.constant 2.44331568E-5 : f32
    %24 = vector.broadcast %cst_7 : f32 to vector<8x32xf32>
    %25 = arith.mulf %24, %13 : vector<8x32xf32>
    %cst_8 = arith.constant 0.00138873165 : f32
    %26 = vector.broadcast %cst_8 : f32 to vector<8x32xf32>
    %27 = arith.subf %25, %26 : vector<8x32xf32>
    %28 = arith.mulf %27, %13 : vector<8x32xf32>
    %cst_9 = arith.constant 0.0416666456 : f32
    %29 = vector.broadcast %cst_9 : f32 to vector<8x32xf32>
    %30 = arith.addf %28, %29 : vector<8x32xf32>
    %cst_10 = arith.constant 5.000000e-01 : f32
    %31 = vector.broadcast %cst_10 : f32 to vector<8x32xf32>
    %32 = arith.mulf %31, %13 : vector<8x32xf32>
    %cst_11 = arith.constant 1.000000e+00 : f32
    %33 = vector.broadcast %cst_11 : f32 to vector<8x32xf32>
    %34 = arith.subf %33, %32 : vector<8x32xf32>
    %35 = arith.mulf %13, %13 : vector<8x32xf32>
    %36 = arith.mulf %35, %30 : vector<8x32xf32>
    %37 = arith.addf %34, %36 : vector<8x32xf32>
    %c1_i32 = arith.constant 1 : i32
    %38 = vector.broadcast %c1_i32 : i32 to vector<8x32xi32>
    %39 = arith.andi %6, %38 : vector<8x32xi32>
    %c1_i32_12 = arith.constant 1 : i32
    %40 = vector.broadcast %c1_i32_12 : i32 to vector<8x32xi32>
    %41 = arith.cmpi eq, %39, %40 : vector<8x32xi32>
    %42 = arith.select %41, %37, %23 : vector<8x32xi1>, vector<8x32xf32>
    %43 = arith.select %41, %23, %37 : vector<8x32xi1>, vector<8x32xf32>
    %c2_i32 = arith.constant 2 : i32
    %44 = vector.broadcast %c2_i32 : i32 to vector<8x32xi32>
    %45 = arith.andi %6, %44 : vector<8x32xi32>
    %c30_i32 = arith.constant 30 : i32
    %46 = vector.broadcast %c30_i32 : i32 to vector<8x32xi32>
    %47 = arith.shli %45, %46 : vector<8x32xi32>
    %c1_i32_13 = arith.constant 1 : i32
    %48 = vector.broadcast %c1_i32_13 : i32 to vector<8x32xi32>
    %49 = arith.addi %6, %48 : vector<8x32xi32>
    %c2_i32_14 = arith.constant 2 : i32
    %50 = vector.broadcast %c2_i32_14 : i32 to vector<8x32xi32>
    %51 = arith.andi %49, %50 : vector<8x32xi32>
    %c30_i32_15 = arith.constant 30 : i32
    %52 = vector.broadcast %c30_i32_15 : i32 to vector<8x32xi32>
    %53 = arith.shli %51, %52 : vector<8x32xi32>
    %54 = tpu.bitcast %42 : vector<8x32xf32> -> vector<8x32xi32>
    %55 = arith.xori %54, %47 : vector<8x32xi32>
    %56 = tpu.bitcast %55 : vector<8x32xi32> -> vector<8x32xf32>
    %57 = tpu.bitcast %43 : vector<8x32xf32> -> vector<8x32xi32>
    %58 = arith.xori %57, %53 : vector<8x32xi32>
    %59 = tpu.bitcast %58 : vector<8x32xi32> -> vector<8x32xf32>
    %c0_16 = arith.constant 0 : index
    %c0_17 = arith.constant 0 : index
    %60 = vector.load %arg2[%c0_16, %c0_17] : memref<8x96xf32, #tpu.memory_space<vmem>>, vector<8x32xf32>
    tpu.vector_store %arg2[%c0_16, %c0_17], %0 {strides = array<i32>} : memref<8x96xf32, #tpu.memory_space<vmem>>, vector<8x32xf32>,
    %c0_18 = arith.constant 0 : index
    %c32 = arith.constant 32 : index
    %61 = vector.load %arg2[%c0_18, %c32] : memref<8x96xf32, #tpu.memory_space<vmem>>, vector<8x32xf32>
    tpu.vector_store %arg2[%c0_18, %c32], %56 {strides = array<i32>} : memref<8x96xf32, #tpu.memory_space<vmem>>, vector<8x32xf32>,
    %c0_19 = arith.constant 0 : index
    %c64 = arith.constant 64 : index
    %62 = vector.load %arg2[%c0_19, %c64] : memref<8x96xf32, #tpu.memory_space<vmem>>, vector<8x32xf32>
    tpu.vector_store %arg2[%c0_19, %c64], %59 {strides = array<i32>} : memref<8x96xf32, #tpu.memory_space<vmem>>, vector<8x32xf32>,
    return
  }
  func.func @transform_0(%arg0: i32) -> (i32, i32) {
    %c0_i32 = arith.constant 0 : i32
    %c0_i32_0 = arith.constant 0 : i32
    return %arg0, %c0_i32 : i32, i32
  }
  func.func @transform_1(%arg0: i32) -> (i32, i32) {
    %c0_i32 = arith.constant 0 : i32
    %c0_i32_0 = arith.constant 0 : i32
    return %arg0, %c0_i32 : i32, i32
  }
}

</mosaic_0001>

<bundles_post_ra>
// kernel: tpu_custom_call.1
= control target key start
LH: loop header
LB: loop body
LE: loop exit
PB: predicated region body
PF: predicated region fallthrough
CT: control target
= control target key end

     0   :  { %6 = vsyncpa [#allocation3], 0  ;;  %s610_s0 = inlined_call_operand.hbm [shape: f32[16,32], index: 0, kind: input, shape index: {}]   ;;  %s611_s1 = inlined_call_operand.hbm [shape: f32[16,96], index: 1, kind: output, shape index: {}]  }
   0x1   :  { %8 = vsyncpa [#allocation3 + $0x1], 0 }
   0x2   :  { %9 = vsyncpa [#allocation4], 0 }
   0x3   :  { %11 = vsyncpa [#allocation4 + $0x1], 0  ;;  %s443_s6 = smov 0   ;;  %s445_s7 = smov 0  }
   0x4   :  { %s447_s8 = smov 0   ;;  %s449_s9 = smov 0  }
   0x5 LB: > { %s464_s10 = sadd.s32 4294967295, %s427_s9   ;;  %s267_s11 = sadd.s32 4294967294, %s427_s9   ;;  %s427_s9 = sphi %s449_s9, %s626_s9   ;;  %s423_s8 = sphi %s447_s8, %s625_s8   ;;  %s419_s7 = sphi %s445_s7, %s624_s7   ;;  %s415_s6 = sphi %s443_s6, %s623_s6  }
   0x6   : > { %s468_s12 = sadd.s32 1, %s427_s9   ;;  %s24_s13 = sadd.s32 1, %s423_s8 }
   0x7   : > { %s21_s14 = ssub.s32 %s427_s9, %s468_s12  ;;  %p31_p0 = scmp.ne.s32.totalorder %s423_s8, %s419_s7 }
   0x8   : > { %p22_p1 = scmp.eq.s32.totalorder %s21_s14, 0  ;;  %p32_p2 = scmp.eq.s32.totalorder %s427_s9, 0 }
   0x9   : > { %p37_p3 = scmp.ne.s32.totalorder %s419_s7, %s415_s6  ;;  %p38_p4 = scmp.eq.s32.totalorder %s464_s10, 0 }
   0xa   : > { %s480_s15 = scalar_select %p22_p1, %s423_s8, %s24_s13  }
   0xb   : > { %p482_p5 = por %p32_p2, %p31_p0  ;;  %p486_p6 = por %p38_p4, %p37_p3 }
   0xc   : > { %p61_p7 = scmp.eq.s32.totalorder %s464_s10, 1  ;;  %p67_p8 = scmp.eq.s32.totalorder %s267_s11, 1 }
   0xd   : > { %p295_p10 = scmp.lt.s32.totalorder %s427_s9, 2  ;;  %s87_s20 = sand.u32 1, %s423_s8  }
   0xe   : > { %p493_p11 = por %p61_p7, %p31_p0  ;;  %p497_p12 = por %p67_p8, %p37_p3 }
   0xf   : > { %s271_s21 = sshll.u32 %s427_s9, 7  ;;  %s270_s22 = sshll.u32 %s87_s20, 3 }
  0x10   : > { %s615_s18 = scalar_select %p493_p11, 1, 0 }
  0x11   : > { %s616_s19 = scalar_select %p497_p12, 1, 0 }
  0x12   : > { %s506_s25 = scalar_lea.hbm %s610_s0, %s271_s21  ;;  %s91_s26 = scalar_lea.vmem [#allocation2], %s270_s22 }
  0x13   : > { %s98_s27 = sshll.u32 %s91_s26, 4  ;;  %p510_p13 = pnand %p295_p10, %p482_p5  ;;  %s514_s27 = int_to_ptr.vmem [resolvable:$true] %s98_s27 }
  0x14   : > { %s88_s29 = scalar_lea.sflag [#allocation3], %s87_s20  ;;  %s331_s30 = scalar_lea.hbm %s506_s25, 128 }
  0x15   : > { %p332_p2 = scmp.ne.s32.totalorder %s506_s25, %s331_s30  ;;  %p333_p3 = pneg %p510_p13 }
  0x16   : > { %s336_s4 = scalar_lea.hbm %s610_s0, 256  ;;  %p337_p5 = scmp.lt.u32.totalorder %s506_s25, %s610_s0 }
  0x17   : > { %p334_p4 = pnand %p333_p3, %p332_p2  ;;  %p338_p8 = scmp.lt.u32.totalorder %s336_s4, %s331_s30 }
  0x18   : > { %p340_p9 = scmp.lt.u32.totalorder %s331_s30, %s506_s25 }
  0x19   : > { %p335_p7 = pneg %p334_p4  ;;  %p339_p10 = por %p338_p8, %p337_p5 }
  0x1b   : > { %p341_p0 = por %p340_p9, %p339_p10 }
  0x1d   : > { %p342_p1 = pnand %p341_p0, %p335_p7 }
  0x1f   : > { %345 = shalt.err (!%p342_p1)
}
  0x20   : > { %s346_s13 = scalar_lea.vmem %s514_s27, 128  ;;  %s429_s14 = smov [#allocation2]  }
  0x21   : > { %p347_p2 = scmp.ne.s32.totalorder %s514_s27, %s346_s13  ;;  %s351_s16 = sshll.u32 %s429_s14, 4  ;;  %s352_s16 = int_to_ptr.vmem [resolvable:$false] %s351_s16 }
  0x22   : > { %s353_s20 = scalar_lea.vmem %s352_s16, 256  ;;  %p354_p11 = scmp.lt.s32.totalorder %s514_s27, %s352_s16 }
  0x23   : > { %p349_p4 = pnand %p347_p2, %p333_p3  ;;  %p355_p5 = scmp.lt.s32.totalorder %s353_s20, %s346_s13 }
  0x25   : > { %p350_p12 = pneg %p349_p4  ;;  %p356_p8 = por %p355_p5, %p354_p11 }
  0x27   : > { %p357_p9 = pnand %p356_p8, %p350_p12 }
  0x29   : > { %360 = shalt.err (!%p357_p9)
}
  0x2a   : > { %290 = dma.hbm_to_vmem [thread:$0]  (!%p510_p13), %s506_s25, 128, %s514_s27, %s88_s29  }
  0x2b   : > { %p618_p0 = scmp.lt.s32.totalorder %s427_s9, 3  ;;  %p619_p1 = scmp.ge.s32.totalorder %s427_s9, 1 }
  0x2d   : > { %p104_p3 = pnand %p619_p1, %p618_p0 }
  0x2e   : > { %s548_s21 = sand.u32 (!%p104_p3), 1, %s419_s7  }
  0x2f   : > { %107 = sbr.rel (%p104_p3) target bundleno = 218 (0xda), region = 24  ;;  %s273_s22 = sshll.u32 (!%p104_p3), %s548_s21, 3 }
  0x30   : > { %s110_s23 = scalar_lea.sflag (!%p104_p3), [#allocation3], %s548_s21  ;;  %s113_s24 = scalar_lea.vmem (!%p104_p3), [#allocation2], %s273_s22 }
  0x36   : > { %406 = dma.done.wait (%p486_p6), %s110_s23, 128  }
  0x37   : > { %408 = vsyncadd (%p486_p6), %s110_s23, 4294967168  ;;  %vm171_vm0 = vcmask 261120   ;;  %v132_v0 = vld [vmem:[%s113_s24] sm:$0xff]  ;;  %s556_s25 = scalar_lea.vmem [#allocation5], %s273_s22  ;;  %s430_s17 = smov 32   ;;  %vm176_vm2 = vcmask 523520  }
  0x38   : > { %v133_v1 = vmul.f32 0.63661975, %v132_v0  ;;  %172 = vst.msk [vmem:[%s556_s25] sm:$0xff] %vm171_vm0, %v132_v0  ;;  %s431_s26 = smov 64   ;;  %s278_s27 = sshll.u32 %s464_s10, 7  ;;  %vm181_vm3 = vcmask 785920  }
  0x39   : > { %s197_s28 = sshll.u32 %s556_s25, 4  ;;  %s565_s2 = scalar_lea.hbm %s611_s1, %s278_s27  ;;  %s567_s28 = int_to_ptr.vmem [resolvable:$true] %s197_s28 }
  0x3a   : > { %v134_v2 = vadd.f32 0.5, %v133_v1  ;;  %s184_s3 = scalar_lea.sflag [#allocation4], %s548_s21  ;;  %s361_s4 = scalar_lea.vmem %s567_s28, 128 }
  0x3b   : > { %p362_p6 = scmp.ne.s32.totalorder %s567_s28, %s361_s4  ;;  %p620_p11 = scmp.ne.s32.totalorder %s615_s18, 0 }
  0x3c   : > { %v135_v3 = vfloor.f32 %v134_v2  ;;  %s432_s10 = smov [#allocation5]  }
  0x3d   : > { %p363_p12 = pnand %p362_p6, %p620_p11  ;;  %s365_s5 = sshll.u32 %s432_s10, 4  ;;  %s366_s5 = int_to_ptr.vmem [resolvable:$false] %s365_s5 }
  0x3e   : > { %v137_v4 = vmul.f32 1.5703125, %v135_v3  ;;  %v139_v5 = vmul.f32 0.0004837513, %v135_v3  ;;  %v281_v8 = vtrunc.f32 %v135_v3  ;;  %s367_s11 = scalar_lea.vmem %s366_s5, 256  ;;  %p368_p7 = scmp.lt.s32.totalorder %s567_s28, %s366_s5 }
  0x3f   : > { %p364_p13 = pneg %p363_p12  ;;  %p369_p10 = scmp.lt.s32.totalorder %s367_s11, %s361_s4 }
  0x40   : > { %v138_v6 = vsub.f32 %v132_v0, %v137_v4  ;;  %v282_v12 = vcvt.f32.s32 %v281_v8 }
  0x41   : > { %p370_p2 = por %p369_p10, %p368_p7 }
  0x42   : > { %v140_v7 = vsub.f32 %v138_v6, %v139_v5  ;;  %v164_v16 = vadd.s32 1, %v282_v12  ;;  %v158_v21 = vand.u32 1, %v282_v12  ;;  %v162_v22 = vand.u32 2, %v282_v12 }
  0x43   : > { %p371_p4 = pnand %p370_p2, %p364_p13 }
  0x44   : > { %v141_v9 = vmul.f32 %v140_v7, %v140_v7  ;;  %v165_v26 = vand.u32 2, %v164_v16  ;;  %vm159_vm1 = vcmp.eq.s32.totalorder %v158_v21, 1  ;;  %v163_v29 = vshll.u32 %v162_v22, 30 }
  0x46   : > { %v142_v10 = vmul.f32 -0.00019515296, %v141_v9  ;;  %v149_v11 = vmul.f32 2.4433157e-05, %v141_v9  ;;  %v153_v15 = vmul.f32 0.5, %v141_v9  ;;  %v146_v18 = vmul.f32 %v141_v9, %v140_v7 }
  0x47   : > { %v155_v20 = vmul.f32 %v141_v9, %v141_v9  ;;  %v166_v32 = vshll.u32 %v165_v26, 30 }
  0x48   : > { %v143_v13 = vadd.f32 0.008332161, %v142_v10  ;;  %v276_v14 = vadd.f32 -0.0013887316, %v149_v11  ;;  %v154_v25 = vsub.f32 1.0, %v153_v15 }
  0x4a   : > { %v144_v17 = vmul.f32 %v143_v13, %v141_v9  ;;  %v151_v19 = vmul.f32 %v276_v14, %v141_v9 }
  0x4c   : > { %v275_v23 = vadd.f32 -0.16666655, %v144_v17  ;;  %v152_v24 = vadd.f32 0.041666646, %v151_v19 }
  0x4e   : > { %v147_v27 = vmul.f32 %v275_v23, %v146_v18  ;;  %v156_v28 = vmul.f32 %v155_v20, %v152_v24 }
  0x50   : > { %v148_v30 = vadd.f32 %v147_v27, %v140_v7  ;;  %v157_v31 = vadd.f32 %v156_v28, %v154_v25 }
  0x52   : > { %v160_v33 = vsel %vm159_vm1, %v157_v31, %v148_v30  ;;  %v161_v34 = vsel %vm159_vm1, %v148_v30, %v157_v31 }
  0x53   : > { %v168_v35 = vxor.u32 %v163_v29, %v160_v33  ;;  %v170_v36 = vxor.u32 %v166_v32, %v161_v34 }
  0x55   : > { %173 = vrot.lane.b32.xlu0 %v168_v35, %s430_s17 }
  0x59   : > { %178 = vrot.lane.b32.xlu0 %v170_v36, %s431_s26 }
  0xc7   : > { %v174_v37 = vpop.permute.xlu0 %173 }
  0xc8   : > { %177 = vst.msk [vmem:[%s556_s25] sm:$0xff] %vm176_vm2, %v174_v37 }
  0xcb   : > { %v179_v38 = vpop.permute.xlu0 %178 }
  0xcc   : > { %182 = vst.msk [vmem:[%s556_s25] sm:$0xff] %vm181_vm3, %v179_v38 }
  0xcd   : > { %374 = shalt.err (!%p371_p4)
}
  0xce   : > { %s375_s13 = scalar_lea.hbm %s565_s2, 128  ;;  %s379_s20 = scalar_lea.hbm %s611_s1, 256 }
  0xcf   : > { %p376_p5 = scmp.ne.s32.totalorder %s565_s2, %s375_s13  ;;  %p380_p0 = scmp.lt.u32.totalorder %s565_s2, %s611_s1 }
  0xd0   : > { %p381_p1 = scmp.lt.u32.totalorder %s379_s20, %s375_s13  ;;  %p383_p6 = scmp.lt.u32.totalorder %s375_s13, %s565_s2 }
  0xd1   : > { %p377_p8 = pnand %p376_p5, %p620_p11 }
  0xd2   : > { %p382_p3 = por %p381_p1, %p380_p0 }
  0xd3   : > { %p378_p9 = pneg %p377_p8 }
  0xd4   : > { %p384_p12 = por %p383_p6, %p382_p3 }
  0xd6   : > { %p385_p13 = pnand %p384_p12, %p378_p9 }
  0xd8   : > { %388 = shalt.err (!%p385_p13)
}
  0xd9   : > { %285 = dma.vmem_to_hbm [thread:$0]  (%p620_p11), %s567_s28, 128, %s565_s2, %s184_s3  }
  0xda PF: > { %s209_s23 = sand.u32 1, %s415_s6   ;;  %p621_p7 = scmp.ne.s32.totalorder %s616_s19, 0 }
  0xdb   : > { %p622_p10 = scmp.ge.s32.totalorder %s427_s9, 2  ;;  %s210_s24 = scalar_lea.sflag [#allocation4], %s209_s23 }
  0xdd   : > { %p292_p2 = pnand %p622_p10, %p621_p7 }
  0xdf   : > { %410 = dma.done.wait (!%p292_p2), %s210_s24, 128  }
  0xe0   : > { %412 = vsyncadd (!%p292_p2), %s210_s24, 4294967168  ;;  %p14_p4 = scmp.ge.s32.totalorder %s468_s12, 4   ;;  %s623_s6 = smov %s419_s7 }
  0xe1   : > { %s624_s7 = smov %s423_s8  ;;  %s625_s8 = smov %s480_s15 }
  0xe2   : > { %s626_s9 = smov %s468_s12  ;;  %16 = sbr.rel (!%p14_p4) target bundleno = 5 (0x5), region = 69 }
  0xe9   :  { %215 = vsyncpa [#allocation3], 1 }
  0xea   :  { %217 = vsyncpa [#allocation3 + $0x1], 1 }
  0xeb   :  { %218 = vsyncpa [#allocation4], 1 }
  0xec   :  { %220 = vsyncpa [#allocation4 + $0x1], 1 }

</bundles_post_ra>
